<compile_context>
chip_gen: v5e
topology: v5e:2x2
jax: 0.10.0
libtpu: 0.0.40
codegen_flags: <defaults>
</compile_context>

<pallas_src>
import jax
import jax.numpy as jnp
from jax import lax
from jax.experimental import pallas as pl
from jax.experimental.pallas import tpu as pltpu


def _dwconvres_kernel(xp_ref, wdw_ref, b1_ref, wpb_ref, b2_ref, o_ref):
    """Fused depthwise-3x3 + BN1 + LeakyReLU(0.1) + pointwise-1x1 + BN2.

    xp_ref : (TH+2, (W+2)*Cin)  pre-padded input row band, (W,C) on lanes
    wdw_ref: (3, 3, W*Cin)      depthwise weights * BN1 scale, tiled over W
    b1_ref : (1, W*Cin)         folded BN1 bias, tiled over W
    wpb_ref: (W*Cin, W*Cout)    block-diagonal pointwise weights * BN2 scale
    b2_ref : (1, W*Cout)        folded BN2 bias, tiled over W
    o_ref  : (TH, W*Cout)       lane-dense output slab
    """
    TH = o_ref.shape[0]
    WCin = wdw_ref.shape[2]
    Cin = (xp_ref.shape[1] - WCin) // 2      # xp lanes = (W + 2) * Cin

    # Depthwise 3x3 = 9 shifted MACs.  Each tap indexes the ref directly; the
    # dx shift is a static lane offset of dx*Cin on the collapsed lane axis.
    acc = jnp.zeros((TH, WCin), dtype=jnp.float32)
    for dy in range(3):
        for dx in range(3):
            tap = xp_ref[dy:dy + TH, dx * Cin:dx * Cin + WCin]
            w = wdw_ref[dy, dx, :]
            acc = acc + tap.astype(jnp.float32) * w.astype(jnp.float32)

    # BN1 (scale already folded into the weights) + LeakyReLU(0.1).
    y = acc + b1_ref[0].astype(jnp.float32)
    y = jnp.where(y > 0, y, 0.1 * y)

    # Pointwise 1x1 conv + BN2 as one MXU matmul against the block-diagonal
    # weight; output is already lane-dense (TH, W*Cout).
    z = jnp.dot(y, wpb_ref[...].astype(jnp.float32),
                preferred_element_type=jnp.float32)
    z = z + b2_ref[0].astype(jnp.float32)
    o_ref[...] = z.astype(o_ref.dtype)


def _pick_tile_h(H, W, Cin, Cout, budget_bytes=8 << 20):
    """Rows per grid step: a multiple of 8 that divides H, sized so the
    double-buffered input band + output slab stay well inside VMEM, preferring
    >= 2 row tiles so the spatial grid axis actually pipelines and can be
    spread across TensorCores."""
    bytes_per_row = 4 * 2 * ((W + 2) * Cin + W * Cout)
    cap = max(8, budget_bytes // max(bytes_per_row, 1))
    best = None
    th = 8
    while th <= min(H, cap):
        if H % th == 0 and (H // th) >= 2:
            best = th
        th += 8
    return best if best is not None else H


def depthwise_conv_res(x_nchw, w_dw, bn1, w_pw, bn2, *, tile_h=None):
    """x_nchw: (N,Cin,H,W); w_dw: (Cin,1,3,3); w_pw: (Cout,Cin,1,1);
    bn1/bn2: (gamma, beta, running_mean, running_var).  Returns (N,Cout,H,W)."""
    N, Cin, H, W = x_nchw.shape
    Cout = w_pw.shape[0]
    eps = 1e-4
    f32 = jnp.float32

    # Fold inference BN into per-channel scale/bias, then fold the scales into
    # the (linear) conv weights so the kernel only adds biases.
    g1, b1, m1, v1 = bn1
    s1 = g1 / jnp.sqrt(v1 + eps)
    o1 = b1 - m1 * s1                      # bias is NOT rescaled again
    g2, b2, m2, v2 = bn2
    s2 = g2 / jnp.sqrt(v2 + eps)
    o2 = b2 - m2 * s2

    # (Cin,1,3,3) -> (3,3,Cin), scale by s1, tile over W -> (3,3,W*Cin).
    w_dw_hwc = jnp.transpose(w_dw[:, 0, :, :], (1, 2, 0)) * s1[None, None, :]
    w_dw_tile = jnp.tile(w_dw_hwc.astype(f32), (1, 1, W))
    b1_tile = jnp.tile(o1.astype(f32), (W,)).reshape(1, W * Cin)
    # (Cout,Cin,1,1) -> (Cin,Cout), columns scaled by s2, block-diag over W.
    w_pw_ck = (jnp.transpose(w_pw[:, :, 0, 0], (1, 0)) * s2[None, :]).astype(f32)
    w_pw_blk = jnp.kron(jnp.eye(W, dtype=f32), w_pw_ck)        # (W*Cin, W*Cout)
    b2_tile = jnp.tile(o2.astype(f32), (W,)).reshape(1, W * Cout)

    # Spatial row tiling with a 1-row halo; bands are pre-sliced in the wrapper
    # so the kernel BlockSpec stays a plain blocked index map.
    TH = tile_h if tile_h is not None else _pick_tile_h(H, W, Cin, Cout)
    if H % TH != 0:
        TH = H
    nT = H // TH

    # NCHW -> NHWC, pad spatially, collapse (W+2, Cin) onto the lane axis.
    x_nhwc = jnp.transpose(x_nchw, (0, 2, 3, 1))               # (N,H,W,Cin)
    xp = jnp.pad(x_nhwc, ((0, 0), (1, 1), (1, 1), (0, 0)))     # (N,H+2,W+2,Cin)
    rows = jnp.arange(nT)[:, None] * TH + jnp.arange(TH + 2)[None, :]
    x_bands = xp[:, rows]                                      # (N,nT,TH+2,W+2,Cin)
    x_bands = x_bands.reshape(N, nT, TH + 2, (W + 2) * Cin)

    # Explicit VMEM budget, re-derived from the tile sizes (v7x: 64 MiB VMEM).
    est_bytes = 4 * (
        2 * (TH + 2) * (W + 2) * Cin          # input band, double-buffered
        + 2 * TH * W * Cout                   # output slab, double-buffered
        + 9 * W * Cin + W * Cin               # depthwise weights + bias
        + W * Cin * W * Cout + W * Cout       # block-diag pointwise + bias
        + 3 * TH * W * max(Cin, Cout))        # live f32 intermediates
    vmem_limit = int(min(max(2 * est_bytes, 4 << 20), 32 << 20))

    out = pl.pallas_call(
        _dwconvres_kernel,
        out_shape=jax.ShapeDtypeStruct((N, H, W * Cout), x_nchw.dtype),
        grid_spec=pltpu.PrefetchScalarGridSpec(
            num_scalar_prefetch=0,
            grid=(N, nT),
            in_specs=[
                pl.BlockSpec((None, None, TH + 2, (W + 2) * Cin),
                             lambda n, t: (n, t, 0, 0)),
                pl.BlockSpec((3, 3, W * Cin), lambda n, t: (0, 0, 0)),
                pl.BlockSpec((1, W * Cin), lambda n, t: (0, 0)),
                pl.BlockSpec((W * Cin, W * Cout), lambda n, t: (0, 0)),
                pl.BlockSpec((1, W * Cout), lambda n, t: (0, 0)),
            ],
            out_specs=pl.BlockSpec((None, TH, W * Cout),
                                   lambda n, t: (n, t, 0)),
        ),
        compiler_params=pltpu.CompilerParams(
            dimension_semantics=("parallel", "parallel"),
            vmem_limit_bytes=vmem_limit),
    )(x_bands, w_dw_tile, b1_tile, w_pw_blk, b2_tile)

    out = out.reshape(N, H, W, Cout)
    return jnp.transpose(out, (0, 3, 1, 2))


def _reference(x_nchw, w_dw, bn1, w_pw, bn2):
    """Plain-JAX reference (NCHW, mirrors the PyTorch forward in eval mode)."""
    eps = 1e-4
    Cin = x_nchw.shape[1]
    y = lax.conv_general_dilated(
        x_nchw, w_dw, window_strides=(1, 1), padding=((1, 1), (1, 1)),
        dimension_numbers=("NCHW", "OIHW", "NCHW"),
        feature_group_count=Cin)
    g1, b1, m1, v1 = bn1
    y = (y - m1[None, :, None, None]) / jnp.sqrt(v1[None, :, None, None] + eps)
    y = y * g1[None, :, None, None] + b1[None, :, None, None]
    y = jnp.where(y > 0, y, 0.1 * y)
    z = lax.conv_general_dilated(
        y, w_pw, window_strides=(1, 1), padding=((0, 0), (0, 0)),
        dimension_numbers=("NCHW", "OIHW", "NCHW"))
    g2, b2, m2, v2 = bn2
    z = (z - m2[None, :, None, None]) / jnp.sqrt(v2[None, :, None, None] + eps)
    z = z * g2[None, :, None, None] + b2[None, :, None, None]
    return z


if __name__ == "__main__":
    key = jax.random.PRNGKey(0)
    N, Cin, Cout, H, W = 2, 4, 8, 16, 16

    ks = jax.random.split(key, 12)
    x = jax.random.normal(ks[0], (N, Cin, H, W), dtype=jnp.float32)

    # Deterministic synthetic parameters (shapes match the PyTorch module).
    w_dw = jax.random.normal(ks[1], (Cin, 1, 3, 3), dtype=jnp.float32) * 0.3
    bn1 = (jax.random.normal(ks[2], (Cin,)) * 0.1 + 1.0,   # gamma
           jax.random.normal(ks[3], (Cin,)) * 0.1,          # beta
           jax.random.normal(ks[4], (Cin,)) * 0.1,          # running_mean
           jax.random.uniform(ks[5], (Cin,)) * 0.5 + 0.5)   # running_var
    w_pw = jax.random.normal(ks[6], (Cout, Cin, 1, 1), dtype=jnp.float32) * 0.3
    bn2 = (jax.random.normal(ks[7], (Cout,)) * 0.1 + 1.0,
           jax.random.normal(ks[8], (Cout,)) * 0.1,
           jax.random.normal(ks[9], (Cout,)) * 0.1,
           jax.random.uniform(ks[10], (Cout,)) * 0.5 + 0.5)

    out = depthwise_conv_res(x, w_dw, bn1, w_pw, bn2)
    out = jax.block_until_ready(out)

    ref = _reference(x, w_dw, bn1, w_pw, bn2)
    assert out.shape == (N, Cout, H, W)
    assert jnp.allclose(out, ref, atol=2e-4, rtol=2e-4), "mismatch vs reference"

    print("KERNEL_OK")
</pallas_src>

<mosaic_0001>
module attributes {stable_mosaic.version = 11 : i64} {
  func.func @_dwconvres_kernel(%arg0: i32, %arg1: i32, %arg2: memref<1x1x10x72xf32, #tpu.memory_space<vmem>>, %arg3: memref<3x3x64xf32, #tpu.memory_space<vmem>>, %arg4: memref<1x64xf32, #tpu.memory_space<vmem>>, %arg5: memref<64x128xf32, #tpu.memory_space<vmem>>, %arg6: memref<1x128xf32, #tpu.memory_space<vmem>>, %arg7: memref<1x8x128xf32, #tpu.memory_space<vmem>>) attributes {dimension_semantics = [#tpu.dimension_semantics<parallel>, #tpu.dimension_semantics<parallel>], iteration_bounds = array<i64: 2, 2>, scalar_prefetch = 0 : i64, scratch_operands = 0 : i64, tpu.core_type = #tpu.core_type<tc>, window_params = [{transform_indices = @transform_0, window_bounds = array<i64: 1, 1, 10, 72>}, {pipeline_mode = #tpu.pipeline_mode<synchronous>, transform_indices = @transform_1, window_bounds = array<i64: 3, 3, 64>}, {pipeline_mode = #tpu.pipeline_mode<synchronous>, transform_indices = @transform_2, window_bounds = array<i64: 1, 64>}, {pipeline_mode = #tpu.pipeline_mode<synchronous>, transform_indices = @transform_3, window_bounds = array<i64: 64, 128>}, {pipeline_mode = #tpu.pipeline_mode<synchronous>, transform_indices = @transform_4, window_bounds = array<i64: 1, 128>}, {transform_indices = @transform_5, window_bounds = array<i64: 1, 8, 128>}]} {
    %cst = arith.constant 0.000000e+00 : f32
    %0 = vector.broadcast %cst : f32 to vector<8x64xf32>
    %c0 = arith.constant 0 : index
    %c0_0 = arith.constant 0 : index
    %c0_1 = arith.constant 0 : index
    %c0_2 = arith.constant 0 : index
    %1 = vector.load %arg2[%c0, %c0_0, %c0_1, %c0_2] : memref<1x1x10x72xf32, #tpu.memory_space<vmem>>, vector<1x1x8x64xf32>
    %2 = vector.shape_cast %1 : vector<1x1x8x64xf32> to vector<8x64xf32>
    %c0_3 = arith.constant 0 : index
    %c0_4 = arith.constant 0 : index
    %c0_5 = arith.constant 0 : index
    %3 = vector.load %arg3[%c0_3, %c0_4, %c0_5] : memref<3x3x64xf32, #tpu.memory_space<vmem>>, vector<1x1x64xf32>
    %4 = vector.shape_cast %3 : vector<1x1x64xf32> to vector<64xf32>
    %5 = vector.shape_cast %4 : vector<64xf32> to vector<1x64xf32>
    %6 = vector.broadcast %5 : vector<1x64xf32> to vector<8x64xf32>
    %7 = arith.mulf %2, %6 : vector<8x64xf32>
    %8 = arith.addf %0, %7 : vector<8x64xf32>
    %c0_6 = arith.constant 0 : index
    %c0_7 = arith.constant 0 : index
    %c0_8 = arith.constant 0 : index
    %c4 = arith.constant 4 : index
    %9 = vector.load %arg2[%c0_6, %c0_7, %c0_8, %c4] : memref<1x1x10x72xf32, #tpu.memory_space<vmem>>, vector<1x1x8x64xf32>
    %10 = vector.shape_cast %9 : vector<1x1x8x64xf32> to vector<8x64xf32>
    %c0_9 = arith.constant 0 : index
    %c1 = arith.constant 1 : index
    %c0_10 = arith.constant 0 : index
    %11 = vector.load %arg3[%c0_9, %c1, %c0_10] : memref<3x3x64xf32, #tpu.memory_space<vmem>>, vector<1x1x64xf32>
    %12 = vector.shape_cast %11 : vector<1x1x64xf32> to vector<64xf32>
    %13 = vector.shape_cast %12 : vector<64xf32> to vector<1x64xf32>
    %14 = vector.broadcast %13 : vector<1x64xf32> to vector<8x64xf32>
    %15 = arith.mulf %10, %14 : vector<8x64xf32>
    %16 = arith.addf %8, %15 : vector<8x64xf32>
    %c0_11 = arith.constant 0 : index
    %c0_12 = arith.constant 0 : index
    %c0_13 = arith.constant 0 : index
    %c8 = arith.constant 8 : index
    %17 = vector.load %arg2[%c0_11, %c0_12, %c0_13, %c8] : memref<1x1x10x72xf32, #tpu.memory_space<vmem>>, vector<1x1x8x64xf32>
    %18 = vector.shape_cast %17 : vector<1x1x8x64xf32> to vector<8x64xf32>
    %c0_14 = arith.constant 0 : index
    %c2 = arith.constant 2 : index
    %c0_15 = arith.constant 0 : index
    %19 = vector.load %arg3[%c0_14, %c2, %c0_15] : memref<3x3x64xf32, #tpu.memory_space<vmem>>, vector<1x1x64xf32>
    %20 = vector.shape_cast %19 : vector<1x1x64xf32> to vector<64xf32>
    %21 = vector.shape_cast %20 : vector<64xf32> to vector<1x64xf32>
    %22 = vector.broadcast %21 : vector<1x64xf32> to vector<8x64xf32>
    %23 = arith.mulf %18, %22 : vector<8x64xf32>
    %24 = arith.addf %16, %23 : vector<8x64xf32>
    %c0_16 = arith.constant 0 : index
    %c0_17 = arith.constant 0 : index
    %c1_18 = arith.constant 1 : index
    %c0_19 = arith.constant 0 : index
    %25 = vector.load %arg2[%c0_16, %c0_17, %c1_18, %c0_19] : memref<1x1x10x72xf32, #tpu.memory_space<vmem>>, vector<1x1x8x64xf32>
    %26 = vector.shape_cast %25 : vector<1x1x8x64xf32> to vector<8x64xf32>
    %c1_20 = arith.constant 1 : index
    %c0_21 = arith.constant 0 : index
    %c0_22 = arith.constant 0 : index
    %27 = vector.load %arg3[%c1_20, %c0_21, %c0_22] : memref<3x3x64xf32, #tpu.memory_space<vmem>>, vector<1x1x64xf32>
    %28 = vector.shape_cast %27 : vector<1x1x64xf32> to vector<64xf32>
    %29 = vector.shape_cast %28 : vector<64xf32> to vector<1x64xf32>
    %30 = vector.broadcast %29 : vector<1x64xf32> to vector<8x64xf32>
    %31 = arith.mulf %26, %30 : vector<8x64xf32>
    %32 = arith.addf %24, %31 : vector<8x64xf32>
    %c0_23 = arith.constant 0 : index
    %c0_24 = arith.constant 0 : index
    %c1_25 = arith.constant 1 : index
    %c4_26 = arith.constant 4 : index
    %33 = vector.load %arg2[%c0_23, %c0_24, %c1_25, %c4_26] : memref<1x1x10x72xf32, #tpu.memory_space<vmem>>, vector<1x1x8x64xf32>
    %34 = vector.shape_cast %33 : vector<1x1x8x64xf32> to vector<8x64xf32>
    %c1_27 = arith.constant 1 : index
    %c1_28 = arith.constant 1 : index
    %c0_29 = arith.constant 0 : index
    %35 = vector.load %arg3[%c1_27, %c1_28, %c0_29] : memref<3x3x64xf32, #tpu.memory_space<vmem>>, vector<1x1x64xf32>
    %36 = vector.shape_cast %35 : vector<1x1x64xf32> to vector<64xf32>
    %37 = vector.shape_cast %36 : vector<64xf32> to vector<1x64xf32>
    %38 = vector.broadcast %37 : vector<1x64xf32> to vector<8x64xf32>
    %39 = arith.mulf %34, %38 : vector<8x64xf32>
    %40 = arith.addf %32, %39 : vector<8x64xf32>
    %c0_30 = arith.constant 0 : index
    %c0_31 = arith.constant 0 : index
    %c1_32 = arith.constant 1 : index
    %c8_33 = arith.constant 8 : index
    %41 = vector.load %arg2[%c0_30, %c0_31, %c1_32, %c8_33] : memref<1x1x10x72xf32, #tpu.memory_space<vmem>>, vector<1x1x8x64xf32>
    %42 = vector.shape_cast %41 : vector<1x1x8x64xf32> to vector<8x64xf32>
    %c1_34 = arith.constant 1 : index
    %c2_35 = arith.constant 2 : index
    %c0_36 = arith.constant 0 : index
    %43 = vector.load %arg3[%c1_34, %c2_35, %c0_36] : memref<3x3x64xf32, #tpu.memory_space<vmem>>, vector<1x1x64xf32>
    %44 = vector.shape_cast %43 : vector<1x1x64xf32> to vector<64xf32>
    %45 = vector.shape_cast %44 : vector<64xf32> to vector<1x64xf32>
    %46 = vector.broadcast %45 : vector<1x64xf32> to vector<8x64xf32>
    %47 = arith.mulf %42, %46 : vector<8x64xf32>
    %48 = arith.addf %40, %47 : vector<8x64xf32>
    %c0_37 = arith.constant 0 : index
    %c0_38 = arith.constant 0 : index
    %c2_39 = arith.constant 2 : index
    %c0_40 = arith.constant 0 : index
    %49 = vector.load %arg2[%c0_37, %c0_38, %c2_39, %c0_40] : memref<1x1x10x72xf32, #tpu.memory_space<vmem>>, vector<1x1x8x64xf32>
    %50 = vector.shape_cast %49 : vector<1x1x8x64xf32> to vector<8x64xf32>
    %c2_41 = arith.constant 2 : index
    %c0_42 = arith.constant 0 : index
    %c0_43 = arith.constant 0 : index
    %51 = vector.load %arg3[%c2_41, %c0_42, %c0_43] : memref<3x3x64xf32, #tpu.memory_space<vmem>>, vector<1x1x64xf32>
    %52 = vector.shape_cast %51 : vector<1x1x64xf32> to vector<64xf32>
    %53 = vector.shape_cast %52 : vector<64xf32> to vector<1x64xf32>
    %54 = vector.broadcast %53 : vector<1x64xf32> to vector<8x64xf32>
    %55 = arith.mulf %50, %54 : vector<8x64xf32>
    %56 = arith.addf %48, %55 : vector<8x64xf32>
    %c0_44 = arith.constant 0 : index
    %c0_45 = arith.constant 0 : index
    %c2_46 = arith.constant 2 : index
    %c4_47 = arith.constant 4 : index
    %57 = vector.load %arg2[%c0_44, %c0_45, %c2_46, %c4_47] : memref<1x1x10x72xf32, #tpu.memory_space<vmem>>, vector<1x1x8x64xf32>
    %58 = vector.shape_cast %57 : vector<1x1x8x64xf32> to vector<8x64xf32>
    %c2_48 = arith.constant 2 : index
    %c1_49 = arith.constant 1 : index
    %c0_50 = arith.constant 0 : index
    %59 = vector.load %arg3[%c2_48, %c1_49, %c0_50] : memref<3x3x64xf32, #tpu.memory_space<vmem>>, vector<1x1x64xf32>
    %60 = vector.shape_cast %59 : vector<1x1x64xf32> to vector<64xf32>
    %61 = vector.shape_cast %60 : vector<64xf32> to vector<1x64xf32>
    %62 = vector.broadcast %61 : vector<1x64xf32> to vector<8x64xf32>
    %63 = arith.mulf %58, %62 : vector<8x64xf32>
    %64 = arith.addf %56, %63 : vector<8x64xf32>
    %c0_51 = arith.constant 0 : index
    %c0_52 = arith.constant 0 : index
    %c2_53 = arith.constant 2 : index
    %c8_54 = arith.constant 8 : index
    %65 = vector.load %arg2[%c0_51, %c0_52, %c2_53, %c8_54] : memref<1x1x10x72xf32, #tpu.memory_space<vmem>>, vector<1x1x8x64xf32>
    %66 = vector.shape_cast %65 : vector<1x1x8x64xf32> to vector<8x64xf32>
    %c2_55 = arith.constant 2 : index
    %c2_56 = arith.constant 2 : index
    %c0_57 = arith.constant 0 : index
    %67 = vector.load %arg3[%c2_55, %c2_56, %c0_57] : memref<3x3x64xf32, #tpu.memory_space<vmem>>, vector<1x1x64xf32>
    %68 = vector.shape_cast %67 : vector<1x1x64xf32> to vector<64xf32>
    %69 = vector.shape_cast %68 : vector<64xf32> to vector<1x64xf32>
    %70 = vector.broadcast %69 : vector<1x64xf32> to vector<8x64xf32>
    %71 = arith.mulf %66, %70 : vector<8x64xf32>
    %72 = arith.addf %64, %71 : vector<8x64xf32>
    %c0_58 = arith.constant 0 : index
    %c0_59 = arith.constant 0 : index
    %73 = vector.load %arg4[%c0_58, %c0_59] : memref<1x64xf32, #tpu.memory_space<vmem>>, vector<1x64xf32>
    %74 = vector.shape_cast %73 : vector<1x64xf32> to vector<64xf32>
    %75 = vector.shape_cast %74 : vector<64xf32> to vector<1x64xf32>
    %76 = vector.broadcast %75 : vector<1x64xf32> to vector<8x64xf32>
    %77 = arith.addf %72, %76 : vector<8x64xf32>
    %cst_60 = arith.constant 0.000000e+00 : f32
    %78 = vector.broadcast %cst_60 : f32 to vector<8x64xf32>
    %79 = arith.cmpf ogt, %77, %78 : vector<8x64xf32>
    %cst_61 = arith.constant 1.000000e-01 : f32
    %80 = vector.broadcast %cst_61 : f32 to vector<8x64xf32>
    %81 = arith.mulf %80, %77 : vector<8x64xf32>
    %82 = arith.select %79, %77, %81 : vector<8x64xi1>, vector<8x64xf32>
    %c0_62 = arith.constant 0 : index
    %c0_63 = arith.constant 0 : index
    %83 = vector.load %arg5[%c0_62, %c0_63] : memref<64x128xf32, #tpu.memory_space<vmem>>, vector<64x128xf32>
    %cst_64 = arith.constant dense<0.000000e+00> : vector<8x128xf32>
    %84 = tpu.matmul %82, %83, %cst_64 {dimension_numbers = #tpu.dot_dimension_numbers<[1], [0], [0], [1], [0, 0, 1, 1], [], []>} : vector<8x64xf32>, vector<64x128xf32>, vector<8x128xf32> -> vector<8x128xf32>
    %c0_65 = arith.constant 0 : index
    %c0_66 = arith.constant 0 : index
    %85 = vector.load %arg6[%c0_65, %c0_66] : memref<1x128xf32, #tpu.memory_space<vmem>>, vector<1x128xf32>
    %86 = vector.shape_cast %85 : vector<1x128xf32> to vector<128xf32>
    %87 = vector.shape_cast %86 : vector<128xf32> to vector<1x128xf32>
    %88 = vector.broadcast %87 : vector<1x128xf32> to vector<8x128xf32>
    %89 = arith.addf %84, %88 : vector<8x128xf32>
    %c0_67 = arith.constant 0 : index
    %c0_68 = arith.constant 0 : index
    %c0_69 = arith.constant 0 : index
    %90 = vector.load %arg7[%c0_67, %c0_68, %c0_69] : memref<1x8x128xf32, #tpu.memory_space<vmem>>, vector<1x8x128xf32>
    %91 = vector.shape_cast %90 : vector<1x8x128xf32> to vector<8x128xf32>
    %92 = vector.shape_cast %89 : vector<8x128xf32> to vector<1x8x128xf32>
    tpu.vector_store %arg7[%c0_67, %c0_68, %c0_69], %92 {strides = array<i32>} : memref<1x8x128xf32, #tpu.memory_space<vmem>>, vector<1x8x128xf32>,
    return
  }
  func.func @transform_0(%arg0: i32, %arg1: i32) -> (i32, i32, i32, i32) {
    %c0_i32 = arith.constant 0 : i32
    %c0_i32_0 = arith.constant 0 : i32
    %c0_i32_1 = arith.constant 0 : i32
    return %arg0, %arg1, %c0_i32, %c0_i32_0 : i32, i32, i32, i32
  }
  func.func @transform_1(%arg0: i32, %arg1: i32) -> (i32, i32, i32) {
    %c0_i32 = arith.constant 0 : i32
    %c0_i32_0 = arith.constant 0 : i32
    %c0_i32_1 = arith.constant 0 : i32
    %c0_i32_2 = arith.constant 0 : i32
    return %c0_i32, %c0_i32_0, %c0_i32_1 : i32, i32, i32
  }
  func.func @transform_2(%arg0: i32, %arg1: i32) -> (i32, i32) {
    %c0_i32 = arith.constant 0 : i32
    %c0_i32_0 = arith.constant 0 : i32
    %c0_i32_1 = arith.constant 0 : i32
    return %c0_i32, %c0_i32_0 : i32, i32
  }
  func.func @transform_3(%arg0: i32, %arg1: i32) -> (i32, i32) {
    %c0_i32 = arith.constant 0 : i32
    %c0_i32_0 = arith.constant 0 : i32
    %c0_i32_1 = arith.constant 0 : i32
    return %c0_i32, %c0_i32_0 : i32, i32
  }
  func.func @transform_4(%arg0: i32, %arg1: i32) -> (i32, i32) {
    %c0_i32 = arith.constant 0 : i32
    %c0_i32_0 = arith.constant 0 : i32
    %c0_i32_1 = arith.constant 0 : i32
    return %c0_i32, %c0_i32_0 : i32, i32
  }
  func.func @transform_5(%arg0: i32, %arg1: i32) -> (i32, i32, i32) {
    %c0_i32 = arith.constant 0 : i32
    %c0_i32_0 = arith.constant 0 : i32
    return %arg0, %arg1, %c0_i32 : i32, i32, i32
  }
}

</mosaic_0001>

<bundles_post_ra>
// kernel: tpu_custom_call.1
= control target key start
LH: loop header
LB: loop body
LE: loop exit
PB: predicated region body
PF: predicated region fallthrough
CT: control target
= control target key end

     0   :  { %10 = vsyncpa [#allocation3], 0  ;;  %s900_s0 = inlined_call_operand.vmem [shape: f32[2,2,10,72], index: 0, kind: input, shape index: {}]   ;;  %s901_s1 = inlined_call_operand.vmem [shape: f32[3,3,64], index: 1, kind: input, shape index: {}]   ;;  %s902_s2 = inlined_call_operand.vmem [shape: f32[1,64], index: 2, kind: input, shape index: {}]   ;;  %s903_s3 = inlined_call_operand.vmem [shape: f32[64,128], index: 3, kind: input, shape index: {}]   ;;  %s904_s4 = inlined_call_operand.vmem [shape: f32[1,128], index: 4, kind: input, shape index: {}]   ;;  %s905_s5 = inlined_call_operand.hbm [shape: f32[2,16,128], index: 5, kind: output, shape index: {}]  }
   0x1   :  { %12 = vsyncpa [#allocation3 + $0x1], 0  ;;  %s721_s18 = smov 0   ;;  %s723_s19 = smov 0  }
   0x2   :  { %s725_s20 = smov 0   ;;  %s727_s21 = smov 0  }
   0x3   :  { %s729_s22 = smov 0   ;;  %s731_s23 = smov 0  }
   0x4   :  { %s733_s24 = smov 0   ;;  %s735_s25 = smov 0  }
   0x5 LB: > { %s484_s26 = sadd.s32 4294967295, %s685_s25   ;;  %s485_s27 = sadd.s32 4294967294, %s685_s25   ;;  %s685_s25 = sphi %s735_s25, %s18_s25   ;;  %s681_s24 = sphi %s733_s24, %s917_s24   ;;  %s677_s23 = sphi %s731_s23, %s916_s23   ;;  %s673_s22 = sphi %s729_s22, %s915_s22   ;;  %s669_s21 = sphi %s727_s21, %s914_s21   ;;  %s665_s20 = sphi %s725_s20, %s913_s20   ;;  %s661_s19 = sphi %s723_s19, %s912_s19   ;;  %s657_s18 = sphi %s721_s18, %s911_s18  }
   0x6   : > { %s27_s28 = sadd.s32 1, %s677_s23  ;;  %s30_s29 = sadd.s32 1, %s681_s24 }
   0x7   : > { %p28_p0 = scmp.ge.s32.totalorder %s27_s28, 2  ;;  %p161_p1 = scmp.ne.s32.totalorder %s665_s20, %s661_s19 }
   0x8   : > { %p162_p2 = scmp.eq.s32.totalorder %s484_s26, 3  ;;  %p167_p5 = scmp.ne.s32.totalorder %s661_s19, %s657_s18 }
   0x9   : > { %s919_s28 = smov (%p28_p0, %s27_s28), 0  ;;  %s921_s29 = smov (!%p28_p0, %s30_s29), %s681_s24 }
   0xa   : > { %s147_s30 = ssub.s32 %s677_s23, %s919_s28  ;;  %p772_p3 = por %p162_p2, %p161_p1 }
   0xb   : > { %p32_p4 = scmp.ge.s32.totalorder %s921_s29, 2  ;;  %p168_p6 = scmp.eq.s32.totalorder %s485_s27, 3 }
   0xc   : > { %p488_p7 = scmp.ge.s32.totalorder %s685_s25, 1  ;;  %p210_p9 = scmp.lt.s32.totalorder %s685_s25, 5 }
   0xd   : > { %s923_s29 = smov (%p32_p4, %s921_s29), 0  ;;  %p781_p8 = por %p168_p6, %p167_p5 }
   0xe   : > { %908 = sst [smem:[#allocation5_spill]] %s923_s29  ;;  %s146_s8 = ssub.s32 %s681_s24, %s923_s29 }
   0xf   : > { %s151_s9 = sadd.s32 1, %s665_s20  ;;  %s148_s10 = sor.u32 %s147_s30, %s146_s8 }
  0x10   : > { %p211_p10 = pnand %p488_p7, %p210_p9  ;;  %p149_p11 = scmp.eq.s32.totalorder %s148_s10, 0 }
  0x11   : > { %s687_s16 = smov (!%p211_p10), 4   ;;  %s688_s13 = smov (!%p211_p10), 8  }
  0x12   : > { %s790_s11 = scalar_select %p149_p11, %s665_s20, %s151_s9  }
  0x13   : > { %214 = sbr.rel (%p211_p10) target bundleno = 415 (0x19f), region = 40  ;;  %p242_p12 = scmp.lt.s32.totalorder (!%p211_p10), %s673_s22, 1 }
  0x14   : > { %p244_p13 = scmp.lt.s32.totalorder (!%p211_p10), %s669_s21, 1  ;;  %s689_s9 = smov (!%p211_p10), 124  }
  0x15   : > { %s690_s10 = smov (!%p211_p10), 120  }
  0x18   : > { %v580_v0 = vld [vmem:[%s901_s1 + $0x1] ss:$0 sm:$0xff]  ;;  %v581_v1 = vld [vmem:[%s901_s1 + $0x5] ss:$0 sm:$0xff]  ;;  %v584_v2 = vld [vmem:[%s901_s1 + $0x9] ss:$0 sm:$0xff] }
  0x19   : > { %259 = vrot.lane.b32.xlu0 %v580_v0, %s687_s16  ;;  %289 = vrot.lane.b32.xlu1 %v581_v1, %s687_s16  ;;  %v582_v3 = vld [vmem:[%s901_s1 + $0x2] ss:$0 sm:$0xff]  ;;  %v583_v4 = vld [vmem:[%s901_s1 + $0x6] ss:$0 sm:$0xff]  ;;  %s243_s14 = scalar_select %p242_p12, %s673_s22, 1  ;;  %vm360_vm1 = vcmask 523264  }
  0x1a   : > { %319 = vrot.lane.b32.xlu2 %v584_v2, %s687_s16  ;;  %v585_v5 = vld [vmem:[%s901_s1 + $0xa] ss:$0 sm:$0xff]  ;;  %s245_s15 = scalar_select %p244_p13, %s669_s21, 1  ;;  %v355_v21 = vld [vmem:[%s903_s3 + $0x38] sm:$0xff]  ;;  %v354_v22 = vld [vmem:[%s903_s3 + $0x30] sm:$0xff] }
  0x1b   : > { %s491_s17 = sshll.u32 %s243_s14, 2  ;;  %372 = vmatpush.msra.mxu0 %v355_v21  ;;  %v353_v23 = vld [vmem:[%s903_s3 + $0x28] sm:$0xff]  ;;  %v352_v24 = vld [vmem:[%s903_s3 + $0x20] sm:$0xff]  ;;  %v351_v25 = vld [vmem:[%s903_s3 + $0x18] sm:$0xff]  ;;  %s611_s14 = scalar_lea.hbm %s905_s5, 32 }
  0x1c   : > { %s490_s16 = sshll.u32 %s245_s15, 1  ;;  %v350_v26 = vld [vmem:[%s903_s3 + $0x10] sm:$0xff]  ;;  %v349_v27 = vld [vmem:[%s903_s3 + $0x8] sm:$0xff]  ;;  %v348_v28 = vld [vmem:[%s903_s3] sm:$0xff] }
  0x1d   : > { %s248_s26 = sadd.s32 %s491_s17, %s490_s16  ;;  %373 = vmatpush.msra.mxu0 %v354_v22  ;;  %v586_v29 = vld [vmem:[%s901_s1] ss:$0 sm:$0xff]  ;;  %v587_v31 = vld [vmem:[%s901_s1 + $0x4] ss:$0 sm:$0xff]  ;;  %v588_v37 = vld [vmem:[%s901_s1 + $0x8] ss:$0 sm:$0xff] }
  0x1e   : > { %s492_s27 = sshll.u32 %s248_s26, 3  ;;  %v589_v48 = vld [vmem:[%s902_s2] ss:$0 sm:$0xff] }
  0x1f   : > { %s250_s8 = scalar_lea.vmem %s900_s0, %s492_s27  ;;  %374 = vmatpush.msra.mxu0 %v353_v23  ;;  %v590_v53 = vld [vmem:[%s904_s4] ss:$0 sm:$0xff] }
  0x20   : > { %v251_v7 = vld [vmem:[%s250_s8] sm:$0xff] }
  0x21   : > { %271 = vrot.lane.b32.xlu0 %v582_v3, %s688_s13  ;;  %301 = vrot.lane.b32.xlu1 %v583_v4, %s688_s13  ;;  %v280_v8 = vld [vmem:[%s250_s8 + $0x1] sm:$0xff]  ;;  %v254_v30 = vmul.f32 %v586_v29, %v251_v7 }
  0x22   : > { %331 = vrot.lane.b32.xlu2 %v585_v5, %s688_s13  ;;  %v310_v14 = vld [vmem:[%s250_s8 + $0x2] sm:$0xff]  ;;  %375 = vmatpush.msra.mxu0 %v352_v24  ;;  %v284_v34 = vmul.f32 %v587_v31, %v280_v8 }
  0x23   : > { %v314_v42 = vmul.f32 %v588_v37, %v310_v14 }
  0x24   : > { %376 = vmatpush.msra.mxu0 %v351_v25 }
  0x26   : > { %377 = vmatpush.msra.mxu0 %v350_v26 }
  0x28   : > { %378 = vmatpush.msra.mxu0 %v349_v27 }
  0x2a   : > { %379 = vmatpush.msra.mxu0 %v348_v28 }
  0x74   : > { %v320_v6 = vpop.permute.xlu2 %319 }
  0x75   : > { %v322_v20 = vmul.f32 %v320_v6, %v310_v14 }
  0x7c   : > { %v332_v13 = vpop.permute.xlu2 %331 }
  0x7d   : > { %v334_v16 = vmul.f32 %v332_v13, %v310_v14 }
  0x8b   : > { %v260_v9 = vpop.permute.xlu0 %259  ;;  %v290_v11 = vpop.permute.xlu1 %289 }
  0x8c   : > { %v262_v10 = vmul.f32 %v260_v9, %v251_v7  ;;  %v292_v12 = vmul.f32 %v290_v11, %v280_v8 }
  0x8e   : > { %264 = vrot.lane.b32.xlu0 %v262_v10, %s689_s9  ;;  %294 = vrot.lane.b32.xlu2 %v292_v12, %s689_s9 }
  0x93   : > { %v272_v15 = vpop.permute.xlu0 %271  ;;  %v302_v18 = vpop.permute.xlu1 %301 }
  0x94   : > { %v274_v17 = vmul.f32 %v272_v15, %v251_v7  ;;  %v304_v19 = vmul.f32 %v302_v18, %v280_v8 }
  0x96   : > { %276 = vrot.lane.b32.xlu1 %v274_v17, %s690_s10  ;;  %306 = vrot.lane.b32.xlu0 %v304_v19, %s690_s10 }
  0x97   : > { %336 = vrot.lane.b32.xlu2 %v334_v16, %s690_s10  ;;  %s239_s10 = sand.u32 1, %s661_s19  }
  0x98   : > { %s489_s12 = sshll.u32 %s239_s10, 3 }
  0x99   : > { %s241_s27 = scalar_lea.vmem [#allocation2], %s489_s12 }
  0x9a   : > { %s400_s30 = sshll.u32 %s241_s27, 4  ;;  %s401_s30 = int_to_ptr.vmem [resolvable:$true] %s400_s30 }
  0x9e   : > { %324 = vrot.lane.b32.xlu1 %v322_v20, %s689_s9  ;;  %s501_s9 = sshll.u32 %s673_s22, 1 }
  0x9f   : > { %s396_s29 = sadd.s32 %s669_s21, %s501_s9  ;;  %s386_s21 = scalar_lea.sflag [#allocation3], %s239_s10 }
  0xa0   : > { %s502_s13 = sshll.u32 %s396_s29, 3 }
  0xa1   : > { %s398_s16 = scalar_lea.hbm %s905_s5, %s502_s13 }
  0xa2   : > { %s402_s8 = sshll.u32 %s398_s16, 4  ;;  %s403_s8 = int_to_ptr.hbm [resolvable:$true] %s402_s8 }
  0xa3   : > { %s605_s22 = sshra.s32 %s403_s8, 4  ;;  %s606_s22 = int_to_ptr.hbm [resolvable:$true] %s605_s22 }
  0xa4   : > { %s607_s9 = scalar_lea.hbm %s606_s22, 8  ;;  %p612_p4 = scmp.lt.s32.totalorder %s606_s22, %s905_s5 }
  0xa5   : > { %p608_p0 = scmp.ne.s32.totalorder %s606_s22, %s607_s9  ;;  %p613_p5 = scmp.lt.s32.totalorder %s611_s14, %s607_s9 }
  0xa7   : > { %p609_p1 = pnand %p608_p0, %p772_p3  ;;  %p614_p6 = por %p613_p5, %p612_p4 }
  0xa9   : > { %p610_p2 = pneg %p609_p1 }
  0xab   : > { %p615_p7 = pnand %p614_p6, %p610_p2 }
  0xe8   : > { %v295_v38 = vpop.permute.xlu2 %294 }
  0xf1   : > { %v337_v46 = vpop.permute.xlu2 %336 }
 0x100   : > { %v265_v32 = vpop.permute.xlu0 %264 }
 0x101   : > { %v267_v33 = vadd.f32 %v265_v32, %v254_v30 }
 0x108   : > { %v277_v35 = vpop.permute.xlu1 %276  ;;  %v307_v40 = vpop.permute.xlu0 %306 }
 0x109   : > { %v279_v36 = vadd.f32 %v277_v35, %v267_v33 }
 0x10b   : > { %v285_v39 = vadd.f32 %v284_v34, %v279_v36 }
 0x10d   : > { %v297_v41 = vadd.f32 %v295_v38, %v285_v39 }
 0x10f   : > { %v309_v43 = vadd.f32 %v307_v40, %v297_v41 }
 0x110   : > { %v325_v44 = vpop.permute.xlu1 %324 }
 0x111   : > { %v315_v45 = vadd.f32 %v314_v42, %v309_v43 }
 0x113   : > { %v327_v47 = vadd.f32 %v325_v44, %v315_v45 }
 0x115   : > { %v339_v49 = vadd.f32 %v337_v46, %v327_v47 }
 0x117   : > { %v344_v50 = vadd.f32 %v589_v48, %v339_v49 }
 0x119   : > { %vm345_vm0 = vcmp.gt.f32.partialorder %v344_v50, 0.0  ;;  %v346_v51 = vmul.f32 0.1, %v344_v50 }
 0x11b   : > { %v347_v52 = vsel %vm345_vm0, %v344_v50, %v346_v51 }
 0x11c   : > { %499 = vmatmul.msk.f32.vlgmr.msra.gmra.mxu0 %vm360_vm1, %v347_v52 }
 0x199   : > { %v381_v54 = vpop.f32.mrf.mxu0 }
 0x19a   : > { %v382_v55 = vadd.f32 %v590_v53, %v381_v54 }
 0x19c   : > { %384 = vst [vmem:[%s241_s27] sm:$0xff] %v382_v55 }
 0x19d   : > { %618 = shalt.err (!%p615_p7)
}
 0x19e   : > { %505 = dma.vmem_to_hbm [thread:$0]  (%p772_p3), %s401_s30, 128, %s403_s8, %s386_s21  }
 0x19f PF: > { %p511_p9 = scmp.ge.s32.totalorder %s685_s25, 2  ;;  %s414_s10 = sand.u32 1, %s657_s18  }
 0x1a0   : > { %s415_s16 = scalar_lea.sflag [#allocation3], %s414_s10 }
 0x1a1   : > { %p508_p10 = pnand %p511_p9, %p781_p8 }
 0x1a3   : > { %p509_p11 = pneg %p508_p10 }
 0x1a5   : > { %652 = dma.done.wait (%p509_p11), %s415_s16, 128  }
 0x1a6   : > { %654 = vsyncadd (%p509_p11), %s415_s16, 4294967168  ;;  %s18_s25 = sadd.s32 1, %s685_s25   ;;  %s910_s6 = sld [smem:[#allocation5_spill]] }
 0x1a7   : > { %p15_p12 = scmp.ge.s32.totalorder %s18_s25, 6   ;;  %s911_s18 = smov %s661_s19 }
 0x1a8   : > { %s912_s19 = smov %s665_s20  ;;  %s913_s20 = smov %s790_s11 }
 0x1a9   : > { %s914_s21 = smov %s677_s23  ;;  %s915_s22 = smov %s681_s24 }
 0x1aa   : > { %s916_s23 = smov %s919_s28  ;;  %17 = sbr.rel (!%p15_p12) target bundleno = 5 (0x5), region = 77 }
 0x1ac   : > { %s917_s24 = smov %s910_s6 }
 0x1af   :  { %421 = vsyncpa [#allocation3], 1 }
 0x1b0   :  { %423 = vsyncpa [#allocation3 + $0x1], 1 }

</bundles_post_ra>
